<compile_context>
chip_gen: v7x
topology: tpu7x:2x2x1
jax: 0.10.0
libtpu: 0.0.40
codegen_flags: <defaults>
</compile_context>

<pallas_src>
import jax
import jax.numpy as jnp
from jax.experimental import pallas as pl
from jax.experimental.pallas import tpu as pltpu


def ensemble_kernel(xt_ref, w1t_ref, b1c_ref, w2c_ref, b2_ref, cw_ref, cb_ref,
                    logits_ref, losses_ref, comb_ref):
    # xt_ref : [M, 2D, 2B]   embeddings, src||dst on sublanes, pos-over-neg batch on lanes
    # w1t_ref: [M, H, 2D]    MergeLayer fc1 weights (pre-transposed)
    # b1c_ref: [M, H, 1]     fc1 bias as a column (broadcast over lanes)
    # w2c_ref: [M, H, 1]     fc2 weight as a column (output dim is 1)
    # b2_ref : [M]    (SMEM) fc2 bias scalars
    # cw_ref : [M]    (SMEM) combiner weights
    # cb_ref : [1]    (SMEM) combiner bias
    # logits_ref: [M, 2B], losses_ref: [1, M], comb_ref: [1, 2B]
    M = xt_ref.shape[0]
    TB = xt_ref.shape[2]
    B = TB // 2

    # Labels: first B lanes positive (1), last B negative (0).  Hoisted once.
    col = jax.lax.broadcasted_iota(jnp.int32, (1, TB), 1)
    y = (col < B).astype(jnp.float32)                          # [1, 2B]

    comb = jnp.zeros((1, TB), jnp.float32)
    z_rows = []
    loss_cols = []
    for m in range(M):                                         # static unroll (M is tiny)
        # MergeLayer fc1: h = relu(W1 @ [src;dst] + b1), batch on lanes -> [H, 2B]
        h = jnp.dot(w1t_ref[m], xt_ref[m],
                    preferred_element_type=jnp.float32)        # MXU: [H,2D]@[2D,2B]
        h = jnp.maximum(h + b1c_ref[m], 0.0)                   # lane-broadcast bias

        # fc2 has a single output column -> VPU multiply + sublane reduce (no MXU).
        z = jnp.sum(h * w2c_ref[m], axis=0, keepdims=True) + b2_ref[m]   # [1, 2B]
        z_rows.append(z)

        # BCE-with-logits, mean reduction.  exp(-|z|) in (0,1] so log(1+x) here is
        # numerically equivalent to log1p(x) to f32 precision.
        terms = jnp.maximum(z, 0.0) - z * y + jnp.log(1.0 + jnp.exp(-jnp.abs(z)))
        loss_cols.append(jnp.sum(terms, axis=1, keepdims=True) * (1.0 / TB))  # [1,1]

        # Learned linear combiner over the per-model logits.
        comb = comb + cw_ref[m] * z

    # Single lane-dense stores.
    logits_ref[...] = jnp.concatenate(z_rows, axis=0)          # [M, 2B]
    losses_ref[...] = jnp.concatenate(loss_cols, axis=1)       # [1, M]
    comb_ref[...] = comb + cb_ref[0]                           # [1, 2B]


def ensemble_forward(src, dst, nsrc, ndst, w1, b1, w2, b2, cw, cb):
    """Returns (output_logit [2B], individual_losses [M], labels [2B], stacked_logits [2B, M])."""
    M, B, D = src.shape
    H = w1.shape[-1]
    TB = 2 * B
    D2 = 2 * D

    # Wrapper-side layout plumbing (XLA): concatenate pos/neg over batch, src||dst
    # over features, then put batch on the lane axis for the kernel.
    x = jnp.concatenate([jnp.concatenate([src, nsrc], axis=1),
                         jnp.concatenate([dst, ndst], axis=1)], axis=-1)   # [M, 2B, 2D]
    xt = jnp.swapaxes(x, 1, 2)                                             # [M, 2D, 2B]
    w1t = jnp.swapaxes(w1, 1, 2)                                           # [M, H, 2D]
    b1c = jnp.swapaxes(b1, 1, 2)                                           # [M, H, 1]
    w2c = w2                                                               # [M, H, 1]
    b2v = b2.reshape(M)                                                    # [M]

    logits, losses, comb = pl.pallas_call(
        ensemble_kernel,
        out_shape=(
            jax.ShapeDtypeStruct((M, TB), jnp.float32),   # per-model logits (lane dense)
            jax.ShapeDtypeStruct((1, M), jnp.float32),    # per-model BCE losses
            jax.ShapeDtypeStruct((1, TB), jnp.float32),   # combined logits (lane dense)
        ),
        grid_spec=pltpu.PrefetchScalarGridSpec(
            num_scalar_prefetch=0,
            grid=(1,),                                    # single invocation; models loop in-kernel
            in_specs=[
                pl.BlockSpec((M, D2, TB), lambda i: (0, 0, 0)),   # embeddings slab
                pl.BlockSpec((M, H, D2), lambda i: (0, 0, 0)),    # fc1 weights (all models)
                pl.BlockSpec((M, H, 1), lambda i: (0, 0, 0)),     # fc1 bias columns
                pl.BlockSpec((M, H, 1), lambda i: (0, 0, 0)),     # fc2 weight columns
                pl.BlockSpec(memory_space=pltpu.SMEM),            # fc2 bias scalars [M]
                pl.BlockSpec(memory_space=pltpu.SMEM),            # combiner weights [M]
                pl.BlockSpec(memory_space=pltpu.SMEM),            # combiner bias [1]
            ],
            out_specs=[
                pl.BlockSpec((M, TB), lambda i: (0, 0)),
                pl.BlockSpec((1, M), lambda i: (0, 0)),
                pl.BlockSpec((1, TB), lambda i: (0, 0)),
            ],
        ),
        compiler_params=pltpu.CompilerParams(dimension_semantics=("arbitrary",)),
    )(xt, w1t, b1c, w2c, b2v, cw, cb)

    labels = jnp.concatenate([jnp.ones((B,), jnp.float32), jnp.zeros((B,), jnp.float32)])
    output_logit = comb[0]                 # [2B]
    individual_losses = losses[0]          # [M]
    stacked_logits = logits.T              # [2B, M] == torch.stack(logits, dim=-1)
    return output_logit, individual_losses, labels, stacked_logits


def reference_forward(src, dst, nsrc, ndst, w1, b1, w2, b2, cw, cb):
    M, B, D = src.shape
    x_src = jnp.concatenate([src, nsrc], axis=1)             # [M, 2B, D]
    x_dst = jnp.concatenate([dst, ndst], axis=1)
    x = jnp.concatenate([x_src, x_dst], axis=-1)             # [M, 2B, 2D]
    h = jnp.maximum(jnp.einsum('mbd,mdh->mbh', x, w1) + b1, 0.0)
    z = (jnp.einsum('mbh,mho->mbo', h, w2) + b2)[..., 0]     # [M, 2B]
    y = jnp.concatenate([jnp.ones((B,)), jnp.zeros((B,))]).astype(jnp.float32)
    terms = jnp.maximum(z, 0.0) - z * y[None, :] + jnp.log1p(jnp.exp(-jnp.abs(z)))
    losses = terms.mean(axis=1)
    out = z.T @ cw + cb[0]
    return out, losses, y, z.T


if __name__ == "__main__":
    M, B, D, H = 3, 8, 32, 32   # 3 base models, batch 8 (-> 16 pos+neg), 32-d embeddings
    key = jax.random.PRNGKey(0)
    ks = jax.random.split(key, 10)

    src  = jax.random.normal(ks[0], (M, B, D), jnp.float32)
    dst  = jax.random.normal(ks[1], (M, B, D), jnp.float32)
    nsrc = jax.random.normal(ks[2], (M, B, D), jnp.float32)
    ndst = jax.random.normal(ks[3], (M, B, D), jnp.float32)

    # MergeLayer (link-predictor) parameters, one set per base model
    w1 = jax.random.normal(ks[4], (M, 2 * D, H), jnp.float32) * (1.0 / jnp.sqrt(2 * D))
    b1 = jax.random.normal(ks[5], (M, 1, H), jnp.float32) * 0.01
    w2 = jax.random.normal(ks[6], (M, H, 1), jnp.float32) * (1.0 / jnp.sqrt(H))
    b2 = jax.random.normal(ks[7], (M, 1, 1), jnp.float32) * 0.01

    # Learned linear combiner over the M per-model logits
    cw = jax.random.normal(ks[8], (M,), jnp.float32) * 0.5 + (1.0 / M)
    cb = jax.random.normal(ks[9], (1,), jnp.float32) * 0.01

    out, losses, labels, stacked = ensemble_forward(src, dst, nsrc, ndst,
                                                    w1, b1, w2, b2, cw, cb)
    jax.block_until_ready((out, losses, labels, stacked))

    ref_out, ref_losses, ref_labels, ref_stacked = reference_forward(
        src, dst, nsrc, ndst, w1, b1, w2, b2, cw, cb)

    assert jnp.allclose(out, ref_out, rtol=1e-4, atol=1e-4), (out, ref_out)
    assert jnp.allclose(losses, ref_losses, rtol=1e-4, atol=1e-4)
    assert jnp.allclose(labels, ref_labels)
    assert jnp.allclose(stacked, ref_stacked, rtol=1e-4, atol=1e-4)

    print("KERNEL_OK")
</pallas_src>

<mosaic_0001>
module attributes {stable_mosaic.version = 11 : i64} {
  func.func @ensemble_kernel(%arg0: i32, %arg1: memref<3x64x16xf32, #tpu.memory_space<vmem>>, %arg2: memref<3x32x64xf32, #tpu.memory_space<vmem>>, %arg3: memref<3x32x1xf32, #tpu.memory_space<vmem>>, %arg4: memref<3x32x1xf32, #tpu.memory_space<vmem>>, %arg5: memref<3xf32, #tpu.memory_space<smem>>, %arg6: memref<3xf32, #tpu.memory_space<smem>>, %arg7: memref<1xf32, #tpu.memory_space<smem>>, %arg8: memref<3x16xf32, #tpu.memory_space<vmem>>, %arg9: memref<1x3xf32, #tpu.memory_space<vmem>>, %arg10: memref<1x16xf32, #tpu.memory_space<vmem>>) attributes {dimension_semantics = [#tpu.dimension_semantics<arbitrary>], iteration_bounds = array<i64: 1>, scalar_prefetch = 0 : i64, scratch_operands = 0 : i64, tpu.core_type = #tpu.core_type<tc>, window_params = [{pipeline_mode = #tpu.pipeline_mode<synchronous>, transform_indices = @transform_0, window_bounds = array<i64: 3, 64, 16>}, {pipeline_mode = #tpu.pipeline_mode<synchronous>, transform_indices = @transform_1, window_bounds = array<i64: 3, 32, 64>}, {pipeline_mode = #tpu.pipeline_mode<synchronous>, transform_indices = @transform_2, window_bounds = array<i64: 3, 32, 1>}, {pipeline_mode = #tpu.pipeline_mode<synchronous>, transform_indices = @transform_3, window_bounds = array<i64: 3, 32, 1>}, {transform_indices = @transform_4, window_bounds = array<i64: 3>}, {transform_indices = @transform_5, window_bounds = array<i64: 3>}, {transform_indices = @transform_6, window_bounds = array<i64: 1>}, {pipeline_mode = #tpu.pipeline_mode<synchronous>, transform_indices = @transform_7, window_bounds = array<i64: 3, 16>}, {pipeline_mode = #tpu.pipeline_mode<synchronous>, transform_indices = @transform_8, window_bounds = array<i64: 1, 3>}, {pipeline_mode = #tpu.pipeline_mode<synchronous>, transform_indices = @transform_9, window_bounds = array<i64: 1, 16>}]} {
    %0 = tpu.iota {dimensions = array<i32: 1>} : vector<1x16xi32>
    %c8_i32 = arith.constant 8 : i32
    %1 = vector.broadcast %c8_i32 : i32 to vector<1x16xi32>
    %2 = arith.cmpi slt, %0, %1 : vector<1x16xi32>
    %3 = arith.extui %2 : vector<1x16xi1> to vector<1x16xi32>
    %4 = arith.sitofp %3 : vector<1x16xi32> to vector<1x16xf32>
    %cst = arith.constant 0.000000e+00 : f32
    %5 = vector.broadcast %cst : f32 to vector<1x16xf32>
    %c0 = arith.constant 0 : index
    %c0_0 = arith.constant 0 : index
    %c0_1 = arith.constant 0 : index
    %6 = vector.load %arg2[%c0, %c0_0, %c0_1] : memref<3x32x64xf32, #tpu.memory_space<vmem>>, vector<1x32x64xf32>
    %7 = vector.shape_cast %6 : vector<1x32x64xf32> to vector<32x64xf32>
    %c0_2 = arith.constant 0 : index
    %c0_3 = arith.constant 0 : index
    %c0_4 = arith.constant 0 : index
    %8 = vector.load %arg1[%c0_2, %c0_3, %c0_4] : memref<3x64x16xf32, #tpu.memory_space<vmem>>, vector<1x64x16xf32>
    %9 = vector.shape_cast %8 : vector<1x64x16xf32> to vector<64x16xf32>
    %cst_5 = arith.constant dense<0.000000e+00> : vector<32x16xf32>
    %10 = tpu.matmul %7, %9, %cst_5 {dimension_numbers = #tpu.dot_dimension_numbers<[1], [0], [0], [1], [0, 0, 1, 1], [], []>} : vector<32x64xf32>, vector<64x16xf32>, vector<32x16xf32> -> vector<32x16xf32>
    %c0_6 = arith.constant 0 : index
    %c0_7 = arith.constant 0 : index
    %c0_8 = arith.constant 0 : index
    %11 = vector.load %arg3[%c0_6, %c0_7, %c0_8] : memref<3x32x1xf32, #tpu.memory_space<vmem>>, vector<1x32x1xf32>
    %12 = vector.shape_cast %11 : vector<1x32x1xf32> to vector<32x1xf32>
    %13 = vector.broadcast %12 : vector<32x1xf32> to vector<32x16xf32>
    %14 = arith.addf %10, %13 : vector<32x16xf32>
    %cst_9 = arith.constant 0.000000e+00 : f32
    %15 = vector.broadcast %cst_9 : f32 to vector<32x16xf32>
    %16 = arith.maximumf %14, %15 : vector<32x16xf32>
    %c0_10 = arith.constant 0 : index
    %c0_11 = arith.constant 0 : index
    %c0_12 = arith.constant 0 : index
    %17 = vector.load %arg4[%c0_10, %c0_11, %c0_12] : memref<3x32x1xf32, #tpu.memory_space<vmem>>, vector<1x32x1xf32>
    %18 = vector.shape_cast %17 : vector<1x32x1xf32> to vector<32x1xf32>
    %19 = vector.broadcast %18 : vector<32x1xf32> to vector<32x16xf32>
    %20 = arith.mulf %16, %19 : vector<32x16xf32>
    %cst_13 = arith.constant dense<0.000000e+00> : vector<16xf32>
    %21 = vector.multi_reduction <add>, %20, %cst_13 [0] : vector<32x16xf32> to vector<16xf32>
    %22 = vector.shape_cast %21 : vector<16xf32> to vector<1x16xf32>
    %c0_14 = arith.constant 0 : index
    %23 = memref.load %arg5[%c0_14] : memref<3xf32, #tpu.memory_space<smem>>
    %24 = vector.broadcast %23 : f32 to vector<1x16xf32>
    %25 = arith.addf %22, %24 : vector<1x16xf32>
    %cst_15 = arith.constant 0.000000e+00 : f32
    %26 = vector.broadcast %cst_15 : f32 to vector<1x16xf32>
    %27 = arith.maximumf %25, %26 : vector<1x16xf32>
    %28 = arith.mulf %25, %4 : vector<1x16xf32>
    %29 = arith.subf %27, %28 : vector<1x16xf32>
    %30 = math.absf %25 : vector<1x16xf32>
    %cst_16 = arith.constant 0.000000e+00 : f32
    %31 = vector.broadcast %cst_16 : f32 to vector<1x16xf32>
    %32 = arith.subf %31, %30 : vector<1x16xf32>
    %33 = math.exp %32 : vector<1x16xf32>
    %cst_17 = arith.constant 1.000000e+00 : f32
    %34 = vector.broadcast %cst_17 : f32 to vector<1x16xf32>
    %35 = arith.addf %34, %33 : vector<1x16xf32>
    %36 = math.log %35 : vector<1x16xf32>
    %37 = arith.addf %29, %36 : vector<1x16xf32>
    %cst_18 = arith.constant dense<0.000000e+00> : vector<1xf32>
    %38 = vector.multi_reduction <add>, %37, %cst_18 [1] : vector<1x16xf32> to vector<1xf32>
    %39 = vector.shape_cast %38 : vector<1xf32> to vector<1x1xf32>
    %cst_19 = arith.constant 6.250000e-02 : f32
    %40 = vector.broadcast %cst_19 : f32 to vector<1x1xf32>
    %41 = arith.mulf %39, %40 : vector<1x1xf32>
    %c0_20 = arith.constant 0 : index
    %42 = memref.load %arg6[%c0_20] : memref<3xf32, #tpu.memory_space<smem>>
    %43 = vector.broadcast %42 : f32 to vector<1x16xf32>
    %44 = arith.mulf %43, %25 : vector<1x16xf32>
    %45 = arith.addf %5, %44 : vector<1x16xf32>
    %c1 = arith.constant 1 : index
    %c0_21 = arith.constant 0 : index
    %c0_22 = arith.constant 0 : index
    %46 = vector.load %arg2[%c1, %c0_21, %c0_22] : memref<3x32x64xf32, #tpu.memory_space<vmem>>, vector<1x32x64xf32>
    %47 = vector.shape_cast %46 : vector<1x32x64xf32> to vector<32x64xf32>
    %c1_23 = arith.constant 1 : index
    %c0_24 = arith.constant 0 : index
    %c0_25 = arith.constant 0 : index
    %48 = vector.load %arg1[%c1_23, %c0_24, %c0_25] : memref<3x64x16xf32, #tpu.memory_space<vmem>>, vector<1x64x16xf32>
    %49 = vector.shape_cast %48 : vector<1x64x16xf32> to vector<64x16xf32>
    %cst_26 = arith.constant dense<0.000000e+00> : vector<32x16xf32>
    %50 = tpu.matmul %47, %49, %cst_26 {dimension_numbers = #tpu.dot_dimension_numbers<[1], [0], [0], [1], [0, 0, 1, 1], [], []>} : vector<32x64xf32>, vector<64x16xf32>, vector<32x16xf32> -> vector<32x16xf32>
    %c1_27 = arith.constant 1 : index
    %c0_28 = arith.constant 0 : index
    %c0_29 = arith.constant 0 : index
    %51 = vector.load %arg3[%c1_27, %c0_28, %c0_29] : memref<3x32x1xf32, #tpu.memory_space<vmem>>, vector<1x32x1xf32>
    %52 = vector.shape_cast %51 : vector<1x32x1xf32> to vector<32x1xf32>
    %53 = vector.broadcast %52 : vector<32x1xf32> to vector<32x16xf32>
    %54 = arith.addf %50, %53 : vector<32x16xf32>
    %cst_30 = arith.constant 0.000000e+00 : f32
    %55 = vector.broadcast %cst_30 : f32 to vector<32x16xf32>
    %56 = arith.maximumf %54, %55 : vector<32x16xf32>
    %c1_31 = arith.constant 1 : index
    %c0_32 = arith.constant 0 : index
    %c0_33 = arith.constant 0 : index
    %57 = vector.load %arg4[%c1_31, %c0_32, %c0_33] : memref<3x32x1xf32, #tpu.memory_space<vmem>>, vector<1x32x1xf32>
    %58 = vector.shape_cast %57 : vector<1x32x1xf32> to vector<32x1xf32>
    %59 = vector.broadcast %58 : vector<32x1xf32> to vector<32x16xf32>
    %60 = arith.mulf %56, %59 : vector<32x16xf32>
    %cst_34 = arith.constant dense<0.000000e+00> : vector<16xf32>
    %61 = vector.multi_reduction <add>, %60, %cst_34 [0] : vector<32x16xf32> to vector<16xf32>
    %62 = vector.shape_cast %61 : vector<16xf32> to vector<1x16xf32>
    %c1_35 = arith.constant 1 : index
    %63 = memref.load %arg5[%c1_35] : memref<3xf32, #tpu.memory_space<smem>>
    %64 = vector.broadcast %63 : f32 to vector<1x16xf32>
    %65 = arith.addf %62, %64 : vector<1x16xf32>
    %cst_36 = arith.constant 0.000000e+00 : f32
    %66 = vector.broadcast %cst_36 : f32 to vector<1x16xf32>
    %67 = arith.maximumf %65, %66 : vector<1x16xf32>
    %68 = arith.mulf %65, %4 : vector<1x16xf32>
    %69 = arith.subf %67, %68 : vector<1x16xf32>
    %70 = math.absf %65 : vector<1x16xf32>
    %cst_37 = arith.constant 0.000000e+00 : f32
    %71 = vector.broadcast %cst_37 : f32 to vector<1x16xf32>
    %72 = arith.subf %71, %70 : vector<1x16xf32>
    %73 = math.exp %72 : vector<1x16xf32>
    %cst_38 = arith.constant 1.000000e+00 : f32
    %74 = vector.broadcast %cst_38 : f32 to vector<1x16xf32>
    %75 = arith.addf %74, %73 : vector<1x16xf32>
    %76 = math.log %75 : vector<1x16xf32>
    %77 = arith.addf %69, %76 : vector<1x16xf32>
    %cst_39 = arith.constant dense<0.000000e+00> : vector<1xf32>
    %78 = vector.multi_reduction <add>, %77, %cst_39 [1] : vector<1x16xf32> to vector<1xf32>
    %79 = vector.shape_cast %78 : vector<1xf32> to vector<1x1xf32>
    %cst_40 = arith.constant 6.250000e-02 : f32
    %80 = vector.broadcast %cst_40 : f32 to vector<1x1xf32>
    %81 = arith.mulf %79, %80 : vector<1x1xf32>
    %c1_41 = arith.constant 1 : index
    %82 = memref.load %arg6[%c1_41] : memref<3xf32, #tpu.memory_space<smem>>
    %83 = vector.broadcast %82 : f32 to vector<1x16xf32>
    %84 = arith.mulf %83, %65 : vector<1x16xf32>
    %85 = arith.addf %45, %84 : vector<1x16xf32>
    %c2 = arith.constant 2 : index
    %c0_42 = arith.constant 0 : index
    %c0_43 = arith.constant 0 : index
    %86 = vector.load %arg2[%c2, %c0_42, %c0_43] : memref<3x32x64xf32, #tpu.memory_space<vmem>>, vector<1x32x64xf32>
    %87 = vector.shape_cast %86 : vector<1x32x64xf32> to vector<32x64xf32>
    %c2_44 = arith.constant 2 : index
    %c0_45 = arith.constant 0 : index
    %c0_46 = arith.constant 0 : index
    %88 = vector.load %arg1[%c2_44, %c0_45, %c0_46] : memref<3x64x16xf32, #tpu.memory_space<vmem>>, vector<1x64x16xf32>
    %89 = vector.shape_cast %88 : vector<1x64x16xf32> to vector<64x16xf32>
    %cst_47 = arith.constant dense<0.000000e+00> : vector<32x16xf32>
    %90 = tpu.matmul %87, %89, %cst_47 {dimension_numbers = #tpu.dot_dimension_numbers<[1], [0], [0], [1], [0, 0, 1, 1], [], []>} : vector<32x64xf32>, vector<64x16xf32>, vector<32x16xf32> -> vector<32x16xf32>
    %c2_48 = arith.constant 2 : index
    %c0_49 = arith.constant 0 : index
    %c0_50 = arith.constant 0 : index
    %91 = vector.load %arg3[%c2_48, %c0_49, %c0_50] : memref<3x32x1xf32, #tpu.memory_space<vmem>>, vector<1x32x1xf32>
    %92 = vector.shape_cast %91 : vector<1x32x1xf32> to vector<32x1xf32>
    %93 = vector.broadcast %92 : vector<32x1xf32> to vector<32x16xf32>
    %94 = arith.addf %90, %93 : vector<32x16xf32>
    %cst_51 = arith.constant 0.000000e+00 : f32
    %95 = vector.broadcast %cst_51 : f32 to vector<32x16xf32>
    %96 = arith.maximumf %94, %95 : vector<32x16xf32>
    %c2_52 = arith.constant 2 : index
    %c0_53 = arith.constant 0 : index
    %c0_54 = arith.constant 0 : index
    %97 = vector.load %arg4[%c2_52, %c0_53, %c0_54] : memref<3x32x1xf32, #tpu.memory_space<vmem>>, vector<1x32x1xf32>
    %98 = vector.shape_cast %97 : vector<1x32x1xf32> to vector<32x1xf32>
    %99 = vector.broadcast %98 : vector<32x1xf32> to vector<32x16xf32>
    %100 = arith.mulf %96, %99 : vector<32x16xf32>
    %cst_55 = arith.constant dense<0.000000e+00> : vector<16xf32>
    %101 = vector.multi_reduction <add>, %100, %cst_55 [0] : vector<32x16xf32> to vector<16xf32>
    %102 = vector.shape_cast %101 : vector<16xf32> to vector<1x16xf32>
    %c2_56 = arith.constant 2 : index
    %103 = memref.load %arg5[%c2_56] : memref<3xf32, #tpu.memory_space<smem>>
    %104 = vector.broadcast %103 : f32 to vector<1x16xf32>
    %105 = arith.addf %102, %104 : vector<1x16xf32>
    %cst_57 = arith.constant 0.000000e+00 : f32
    %106 = vector.broadcast %cst_57 : f32 to vector<1x16xf32>
    %107 = arith.maximumf %105, %106 : vector<1x16xf32>
    %108 = arith.mulf %105, %4 : vector<1x16xf32>
    %109 = arith.subf %107, %108 : vector<1x16xf32>
    %110 = math.absf %105 : vector<1x16xf32>
    %cst_58 = arith.constant 0.000000e+00 : f32
    %111 = vector.broadcast %cst_58 : f32 to vector<1x16xf32>
    %112 = arith.subf %111, %110 : vector<1x16xf32>
    %113 = math.exp %112 : vector<1x16xf32>
    %cst_59 = arith.constant 1.000000e+00 : f32
    %114 = vector.broadcast %cst_59 : f32 to vector<1x16xf32>
    %115 = arith.addf %114, %113 : vector<1x16xf32>
    %116 = math.log %115 : vector<1x16xf32>
    %117 = arith.addf %109, %116 : vector<1x16xf32>
    %cst_60 = arith.constant dense<0.000000e+00> : vector<1xf32>
    %118 = vector.multi_reduction <add>, %117, %cst_60 [1] : vector<1x16xf32> to vector<1xf32>
    %119 = vector.shape_cast %118 : vector<1xf32> to vector<1x1xf32>
    %cst_61 = arith.constant 6.250000e-02 : f32
    %120 = vector.broadcast %cst_61 : f32 to vector<1x1xf32>
    %121 = arith.mulf %119, %120 : vector<1x1xf32>
    %c2_62 = arith.constant 2 : index
    %122 = memref.load %arg6[%c2_62] : memref<3xf32, #tpu.memory_space<smem>>
    %123 = vector.broadcast %122 : f32 to vector<1x16xf32>
    %124 = arith.mulf %123, %105 : vector<1x16xf32>
    %125 = arith.addf %85, %124 : vector<1x16xf32>
    %126 = tpu.concatenate %25, %65, %105 in 0 : vector<1x16xf32>, vector<1x16xf32>, vector<1x16xf32> -> vector<3x16xf32>
    %c0_63 = arith.constant 0 : index
    %c0_64 = arith.constant 0 : index
    %127 = vector.load %arg8[%c0_63, %c0_64] : memref<3x16xf32, #tpu.memory_space<vmem>>, vector<3x16xf32>
    tpu.vector_store %arg8[%c0_63, %c0_64], %126 {strides = array<i32>} : memref<3x16xf32, #tpu.memory_space<vmem>>, vector<3x16xf32>,
    %128 = tpu.concatenate %41, %81, %121 in 1 : vector<1x1xf32>, vector<1x1xf32>, vector<1x1xf32> -> vector<1x3xf32>
    %c0_65 = arith.constant 0 : index
    %c0_66 = arith.constant 0 : index
    %129 = vector.load %arg9[%c0_65, %c0_66] : memref<1x3xf32, #tpu.memory_space<vmem>>, vector<1x3xf32>
    tpu.vector_store %arg9[%c0_65, %c0_66], %128 {strides = array<i32>} : memref<1x3xf32, #tpu.memory_space<vmem>>, vector<1x3xf32>,
    %c0_67 = arith.constant 0 : index
    %130 = memref.load %arg7[%c0_67] : memref<1xf32, #tpu.memory_space<smem>>
    %131 = vector.broadcast %130 : f32 to vector<1x16xf32>
    %132 = arith.addf %125, %131 : vector<1x16xf32>
    %c0_68 = arith.constant 0 : index
    %c0_69 = arith.constant 0 : index
    %133 = vector.load %arg10[%c0_68, %c0_69] : memref<1x16xf32, #tpu.memory_space<vmem>>, vector<1x16xf32>
    tpu.vector_store %arg10[%c0_68, %c0_69], %132 {strides = array<i32>} : memref<1x16xf32, #tpu.memory_space<vmem>>, vector<1x16xf32>,
    return
  }
  func.func @transform_0(%arg0: i32) -> (i32, i32, i32) {
    %c0_i32 = arith.constant 0 : i32
    %c0_i32_0 = arith.constant 0 : i32
    %c0_i32_1 = arith.constant 0 : i32
    %c0_i32_2 = arith.constant 0 : i32
    return %c0_i32, %c0_i32_0, %c0_i32_1 : i32, i32, i32
  }
  func.func @transform_1(%arg0: i32) -> (i32, i32, i32) {
    %c0_i32 = arith.constant 0 : i32
    %c0_i32_0 = arith.constant 0 : i32
    %c0_i32_1 = arith.constant 0 : i32
    %c0_i32_2 = arith.constant 0 : i32
    return %c0_i32, %c0_i32_0, %c0_i32_1 : i32, i32, i32
  }
  func.func @transform_2(%arg0: i32) -> (i32, i32, i32) {
    %c0_i32 = arith.constant 0 : i32
    %c0_i32_0 = arith.constant 0 : i32
    %c0_i32_1 = arith.constant 0 : i32
    %c0_i32_2 = arith.constant 0 : i32
    return %c0_i32, %c0_i32_0, %c0_i32_1 : i32, i32, i32
  }
  func.func @transform_3(%arg0: i32) -> (i32, i32, i32) {
    %c0_i32 = arith.constant 0 : i32
    %c0_i32_0 = arith.constant 0 : i32
    %c0_i32_1 = arith.constant 0 : i32
    %c0_i32_2 = arith.constant 0 : i32
    return %c0_i32, %c0_i32_0, %c0_i32_1 : i32, i32, i32
  }
  func.func @transform_4(%arg0: i32) -> i32 {
    %c0_i32 = arith.constant 0 : i32
    %c0_i32_0 = arith.constant 0 : i32
    return %c0_i32 : i32
  }
  func.func @transform_5(%arg0: i32) -> i32 {
    %c0_i32 = arith.constant 0 : i32
    %c0_i32_0 = arith.constant 0 : i32
    return %c0_i32 : i32
  }
  func.func @transform_6(%arg0: i32) -> i32 {
    %c0_i32 = arith.constant 0 : i32
    %c0_i32_0 = arith.constant 0 : i32
    return %c0_i32 : i32
  }
  func.func @transform_7(%arg0: i32) -> (i32, i32) {
    %c0_i32 = arith.constant 0 : i32
    %c0_i32_0 = arith.constant 0 : i32
    %c0_i32_1 = arith.constant 0 : i32
    return %c0_i32, %c0_i32_0 : i32, i32
  }
  func.func @transform_8(%arg0: i32) -> (i32, i32) {
    %c0_i32 = arith.constant 0 : i32
    %c0_i32_0 = arith.constant 0 : i32
    %c0_i32_1 = arith.constant 0 : i32
    return %c0_i32, %c0_i32_0 : i32, i32
  }
  func.func @transform_9(%arg0: i32) -> (i32, i32) {
    %c0_i32 = arith.constant 0 : i32
    %c0_i32_0 = arith.constant 0 : i32
    %c0_i32_1 = arith.constant 0 : i32
    return %c0_i32, %c0_i32_0 : i32, i32
  }
}

</mosaic_0001>

<bundles_post_ra>
// kernel: tpu_custom_call.1
= control target key start
LH: loop header
LB: loop body
LE: loop exit
PB: predicated region body
PF: predicated region fallthrough
CT: control target
= control target key end

     0   :  { %16 = vsyncpa [#allocation5], 0  ;;  %s1410_s0 = inlined_call_operand.vmem [shape: f32[3,64,16], index: 0, kind: input, shape index: {}]   ;;  %s1411_s1 = inlined_call_operand.vmem [shape: f32[3,32,64], index: 1, kind: input, shape index: {}]   ;;  %s1412_s2 = inlined_call_operand.vmem [shape: f32[3,32,1], index: 2, kind: input, shape index: {}]   ;;  %s1413_s3 = inlined_call_operand.vmem [shape: f32[3,32,1], index: 3, kind: input, shape index: {}]   ;;  %s1414_s4 = inlined_call_operand.vmem [shape: f32[3], index: 4, kind: input, shape index: {}]   ;;  %s1415_s5 = inlined_call_operand.vmem [shape: f32[3], index: 5, kind: input, shape index: {}]   ;;  %s1416_s6 = inlined_call_operand.<no memory space> [shape: f32[1], index: 6, kind: input, shape index: {}]   ;;  %s1417_s7 = inlined_call_operand.hbm [shape: f32[3,16], index: 7, kind: output, shape index: {0}]   ;;  %s1418_s8 = inlined_call_operand.hbm [shape: f32[1,3], index: 8, kind: output, shape index: {1}]   ;;  %s1419_s9 = inlined_call_operand.hbm [shape: f32[1,16], index: 9, kind: output, shape index: {2}]  }
   0x1   :  { %17 = vsyncpa [#allocation7], 0 }
   0x2   :  { %18 = vsyncpa [#allocation4], 0 }
   0x3   :  { %19 = vsyncpa [#allocation10], 0  ;;  %s34_s11 = sshll.u32 %s1414_s4, 4  ;;  %s44_s14 = sshll.u32 %s1415_s5, 4  ;;  %s35_s11 = int_to_ptr.vmem [resolvable:$true] %s34_s11  ;;  %s45_s14 = int_to_ptr.vmem [resolvable:$true] %s44_s14 }
   0x4   :  { %s968_s15 = scalar_lea.vmem %s35_s11, 16  ;;  %p973_p1 = scmp.lt.s32.totalorder %s35_s11, %s35_s11 }
   0x5   :  { %p969_p0 = scmp.ne.s32.totalorder %s35_s11, %s968_s15  ;;  %p974_p2 = scmp.lt.s32.totalorder %s968_s15, %s968_s15 }
   0x7   :  { %p975_p3 = por %p974_p2, %p973_p1 }
   0x9   :  { %p976_p4 = pnand %p975_p3, %p969_p0 }
   0xb   :  { %979 = shalt.err (!%p976_p4)
}
   0xc   :  { %s1066_s16 = smov [#allocation3]   ;;  %s980_s17 = scalar_lea.vmem %s45_s14, 16 }
   0xd   :  { %37 = dma.vmem_to_smem %s35_s11, 16, %s1066_s16, [#allocation5]  }
   0xe   :  { %p981_p5 = scmp.ne.s32.totalorder %s45_s14, %s980_s17  ;;  %p985_p6 = scmp.lt.s32.totalorder %s45_s14, %s45_s14 }
   0xf   :  { %p986_p7 = scmp.lt.s32.totalorder %s980_s17, %s980_s17 }
  0x11   :  { %p987_p8 = por %p986_p7, %p985_p6 }
  0x13   :  { %p988_p9 = pnand %p987_p8, %p981_p5 }
  0x15   :  { %991 = shalt.err (!%p988_p9)
}
  0x16   :  { %s1067_s4 = smov [#allocation6]  }
  0x17   :  { %47 = dma.vmem_to_smem %s45_s14, 16, %s1067_s4, [#allocation7]  }
  0x18   :  { %1058 = dma.done.wait [#allocation5], 16  }
  0x19   :  { %1059 = vsyncadd [#allocation5], 4294967280 }
  0x1a   :  { %1060 = dma.done.wait [#allocation7], 16  }
  0x1b   :  { %1061 = vsyncadd [#allocation7], 4294967280 }
  0x1c   :  { %56 = sfence }
  0x1d   :  { %v66_v0 = vld [vmem:[%s1410_s0] sm:$0xff]  ;;  %v67_v1 = vld [vmem:[%s1410_s0 + $0x8] sm:$0xff]  ;;  %v68_v5 = vld [vmem:[%s1410_s0 + $0x10] sm:$0xff]  ;;  %v1068_v7 = vmov 0   ;;  %vm98_vm0 = vcmask 523264   ;;  %vm228_vm1 = vcmask 130048  }
  0x1e   :  { %v741_v2 = vld [vmem:[%s1410_s0 + $0x40] sm:$0xff]  ;;  %v891_v3 = vpack.c.bf16 %v67_v1, %v66_v0  ;;  %v742_v4 = vld [vmem:[%s1410_s0 + $0x48] sm:$0xff]  ;;  %v69_v6 = vld [vmem:[%s1410_s0 + $0x18] sm:$0xff]  ;;  %954 = vset.pattern.permute.xlu0 %v1068_v7  ;;  %955 = vset.pattern.permute.xlu1 %v1068_v7  ;;  %s1345_s18 = sld [smem:[#allocation3 + $0x1]]  ;;  %s1350_s19 = sld [smem:[#allocation6]]  ;;  %vm672_vm2 = vcmask 1040384  }
  0x1f   :  { %v907_v8 = vpack.c.bf16 %v742_v4, %v741_v2  ;;  %v895_v9 = vpack.c.bf16 %v69_v6, %v68_v5  ;;  %v743_v10 = vld [vmem:[%s1410_s0 + $0x50] sm:$0xff]  ;;  %v744_v11 = vld [vmem:[%s1410_s0 + $0x58] sm:$0xff]  ;;  %v70_v12 = vld [vmem:[%s1410_s0 + $0x20] sm:$0xff]  ;;  %s787_s20 = sld [smem:[#allocation3 + $0x2]]  ;;  %vm674_vm3 = vcmask 1041408   ;;  %vm676_vm4 = vcmask 124928  }
  0x20   :  { %892 = vmatprep.subr.bf16.mxu0 %v891_v3  ;;  %v911_v13 = vpack.c.bf16 %v744_v11, %v743_v10  ;;  %v71_v14 = vld [vmem:[%s1410_s0 + $0x28] sm:$0xff]  ;;  %v745_v15 = vld [vmem:[%s1410_s0 + $0x60] sm:$0xff]  ;;  %v72_v21 = vld [vmem:[%s1410_s0 + $0x30] sm:$0xff]  ;;  %s788_s21 = sld [smem:[#allocation6 + $0x2]]  ;;  %vm687_vm5 = vcmask 122880  }
  0x21   :  { %v746_v16 = vld [vmem:[%s1410_s0 + $0x68] sm:$0xff]  ;;  %908 = vmatprep.subr.bf16.mxu1 %v907_v8  ;;  %894 = vmatpush3.bf16.msra.mxu0 %v891_v3  ;;  %v899_v17 = vpack.c.bf16 %v71_v14, %v70_v12  ;;  %v62_v18 = vld [vmem:[%s1411_s1] sm:$0xff]  ;;  %v73_v22 = vld [vmem:[%s1410_s0 + $0x38] sm:$0xff] }
  0x22   :  { %910 = vmatpush3.bf16.msra.mxu1 %v907_v8  ;;  %896 = vmatprep.subr.bf16.mxu0 %v895_v9  ;;  %v737_v19 = vld [vmem:[%s1411_s1 + $0x20] sm:$0xff]  ;;  %v915_v20 = vpack.c.bf16 %v746_v16, %v745_v15  ;;  %v747_v23 = vld [vmem:[%s1410_s0 + $0x70] sm:$0xff]  ;;  %v748_v24 = vld [vmem:[%s1410_s0 + $0x78] sm:$0xff]  ;;  %v903_v25 = vpack.c.bf16 %v73_v22, %v72_v21 }
  0x23   :  { %912 = vmatprep.subr.bf16.mxu1 %v911_v13  ;;  %841 = vmatprep.mubr.msk.f32.mxu0 %vm98_vm0, %v62_v18  ;;  %v919_v26 = vpack.c.bf16 %v748_v24, %v747_v23  ;;  %v767_v27 = vld [vmem:[%s1410_s0 + $0x80] sm:$0xff]  ;;  %v768_v28 = vld [vmem:[%s1410_s0 + $0x88] sm:$0xff]  ;;  %v769_v32 = vld [vmem:[%s1410_s0 + $0x90] sm:$0xff] }
  0x24   :  { %863 = vmatprep.mubr.msk.f32.mxu1 %vm98_vm0, %v737_v19  ;;  %v74_v29 = vld [vmem:[%s1412_s2] sm:$0xff]  ;;  %v923_v31 = vpack.c.bf16 %v768_v28, %v767_v27  ;;  %v770_v33 = vld [vmem:[%s1410_s0 + $0x98] sm:$0xff]  ;;  %v75_v34 = vld [vmem:[%s1412_s2 + $0x8] sm:$0xff] }
  0x25   :  { %898 = vmatpush3.bf16.msra.mxu0 %v895_v9  ;;  %v749_v30 = vld [vmem:[%s1412_s2 + $0x20] sm:$0xff]  ;;  %80 = vperm.xlu0 %954, %v74_v29   ;;  %v63_v35 = vld [vmem:[%s1411_s1 + $0x8] sm:$0xff]  ;;  %v64_v38 = vld [vmem:[%s1411_s1 + $0x10] sm:$0xff]  ;;  %v927_v39 = vpack.c.bf16 %v770_v33, %v769_v32 }
  0x26   :  { %914 = vmatpush3.bf16.msra.mxu1 %v911_v13  ;;  %900 = vmatprep.subr.bf16.mxu0 %v899_v17  ;;  %v750_v36 = vld [vmem:[%s1412_s2 + $0x28] sm:$0xff]  ;;  %v771_v40 = vld [vmem:[%s1410_s0 + $0xa0] sm:$0xff]  ;;  %v739_v42 = vld [vmem:[%s1411_s1 + $0x30] sm:$0xff] }
  0x27   :  { %916 = vmatprep.subr.bf16.mxu1 %v915_v20  ;;  %285 = vperm.xlu1 %955, %v749_v30   ;;  %v738_v37 = vld [vmem:[%s1411_s1 + $0x28] sm:$0xff]  ;;  %v65_v43 = vld [vmem:[%s1411_s1 + $0x18] sm:$0xff]  ;;  %v773_v46 = vld [vmem:[%s1410_s0 + $0xb0] sm:$0xff] }
  0x28   :  { %v772_v41 = vld [vmem:[%s1410_s0 + $0xa8] sm:$0xff]  ;;  %v740_v44 = vld [vmem:[%s1411_s1 + $0x38] sm:$0xff]  ;;  %v763_v48 = vld [vmem:[%s1411_s1 + $0x40] sm:$0xff] }
  0x29   :  { %902 = vmatpush3.bf16.msra.mxu0 %v899_v17  ;;  %85 = vperm.xlu0 %954, %v75_v34   ;;  %v931_v45 = vpack.c.bf16 %v772_v41, %v771_v40  ;;  %v774_v47 = vld [vmem:[%s1410_s0 + $0xb8] sm:$0xff]  ;;  %v765_v49 = vld [vmem:[%s1411_s1 + $0x50] sm:$0xff]  ;;  %v775_v50 = vld [vmem:[%s1412_s2 + $0x40] sm:$0xff] }
  0x2a   :  { %918 = vmatpush3.bf16.msra.mxu1 %v915_v20  ;;  %904 = vmatprep.subr.bf16.mxu0 %v903_v25  ;;  %v935_v51 = vpack.c.bf16 %v774_v47, %v773_v46  ;;  %v776_v52 = vld [vmem:[%s1412_s2 + $0x48] sm:$0xff]  ;;  %v76_v53 = vld [vmem:[%s1412_s2 + $0x10] sm:$0xff]  ;;  %v766_v57 = vld [vmem:[%s1411_s1 + $0x58] sm:$0xff] }
  0x2b   :  { %920 = vmatprep.subr.bf16.mxu1 %v919_v26  ;;  %290 = vperm.xlu1 %955, %v750_v36   ;;  %v751_v54 = vld [vmem:[%s1412_s2 + $0x30] sm:$0xff]  ;;  %v764_v55 = vld [vmem:[%s1411_s1 + $0x48] sm:$0xff]  ;;  %v77_v58 = vld [vmem:[%s1412_s2 + $0x18] sm:$0xff]  ;;  %s762_s1 = sld [smem:[#allocation6 + $0x1]] }
  0x2c   :  { %v777_v56 = vld [vmem:[%s1412_s2 + $0x50] sm:$0xff]  ;;  %v200_v59 = vld [vmem:[%s1413_s3] sm:$0xff]  ;;  %v201_v60 = vld [vmem:[%s1413_s3 + $0x8] sm:$0xff] }
  0x2d   :  { %906 = vmatpush3.bf16.msra.mxu0 %v903_v25  ;;  %489 = vperm.xlu0 %954, %v775_v50   ;;  %v752_v61 = vld [vmem:[%s1412_s2 + $0x38] sm:$0xff]  ;;  %v757_v62 = vld [vmem:[%s1413_s3 + $0x20] sm:$0xff]  ;;  %v758_v63 = vld [vmem:[%s1413_s3 + $0x28] sm:$0xff] }
  0x2e   :  { %922 = vmatpush3.bf16.msra.mxu1 %v919_v26  ;;  %924 = vmatprep.subr.bf16.mxu0 %v923_v31  ;;  %v778_v0 = vld [vmem:[%s1412_s2 + $0x58] sm:$0xff]  ;;  %v783_v1 = vld [vmem:[%s1413_s3 + $0x40] sm:$0xff]  ;;  %v784_v2 = vld [vmem:[%s1413_s3 + $0x48] sm:$0xff] }
  0x2f   :  { %939 = vmatprep.subr.bf16.mxu1 %v923_v31  ;;  %494 = vperm.xlu1 %955, %v776_v52   ;;  %v202_v3 = vld [vmem:[%s1413_s3 + $0x10] sm:$0xff]  ;;  %v203_v6 = vld [vmem:[%s1413_s3 + $0x18] sm:$0xff] }
  0x30   :  { %842 = vmatmul.mubr.msk.f32.vlgmr.msra.gmra.mrb[0].mxu0 %vm98_vm0, %v63_v35  ;;  %v759_v4 = vld [vmem:[%s1413_s3 + $0x30] sm:$0xff]  ;;  %v760_v7 = vld [vmem:[%s1413_s3 + $0x38] sm:$0xff] }
  0x31   :  { %864 = vmatmul.mubr.msk.f32.vlgmr.msra.gmra.mrb[0].mxu1 %vm98_vm0, %v738_v37  ;;  %926 = vmatpush3.bf16.msra.mxu0 %v923_v31  ;;  %v785_v5 = vld [vmem:[%s1413_s3 + $0x50] sm:$0xff]  ;;  %v786_v8 = vld [vmem:[%s1413_s3 + $0x58] sm:$0xff]  ;;  %s1342_s3 = sld [smem:[#allocation3]] }
  0x32   :  { %943 = vmatpush3.bf16.msra.mxu1 %v923_v31  ;;  %844 = vmatprep.mubr.msk.f32.mxu0 %vm98_vm0, %v64_v38 }
  0x33   :  { %866 = vmatprep.mubr.msk.f32.mxu1 %vm98_vm0, %v739_v42  ;;  %928 = vmatprep.subr.bf16.mxu0 %v927_v39 }
  0x34   :  { %845 = vmatmul.mubr.msk.f32.gmra.mrb[2].mxu0 %vm98_vm0, %v65_v43  ;;  %940 = vmatprep.subr.bf16.mxu1 %v927_v39 }
  0x35   :  { %867 = vmatmul.mubr.msk.f32.gmra.mrb[2].mxu1 %vm98_vm0, %v740_v44  ;;  %930 = vmatpush3.bf16.msra.mxu0 %v927_v39 }
  0x36   :  { %944 = vmatpush3.bf16.msra.mxu1 %v927_v39  ;;  %932 = vmatprep.subr.bf16.mxu0 %v931_v45 }
  0x37   :  { %941 = vmatprep.subr.bf16.mxu1 %v931_v45  ;;  %885 = vmatprep.mubr.msk.f32.mxu0 %vm98_vm0, %v763_v48 }
  0x38   :  { %888 = vmatprep.mubr.msk.f32.mxu1 %vm98_vm0, %v765_v49  ;;  %90 = vperm.xlu0 %954, %v76_v53  }
  0x39   :  { %934 = vmatpush3.bf16.msra.mxu0 %v931_v45  ;;  %295 = vperm.xlu1 %955, %v751_v54  }
  0x3a   :  { %945 = vmatpush3.bf16.msra.mxu1 %v931_v45  ;;  %936 = vmatprep.subr.bf16.mxu0 %v935_v51 }
  0x3b   :  { %942 = vmatprep.subr.bf16.mxu1 %v935_v51 }
  0x3c   :  { %499 = vperm.xlu0 %954, %v777_v56  }
  0x3d   :  { %938 = vmatpush3.bf16.msra.mxu0 %v935_v51  ;;  %95 = vperm.xlu1 %955, %v77_v58  }
  0x3e   :  { %946 = vmatpush3.bf16.msra.mxu1 %v935_v51 }
  0x40   :  { %886 = vmatmul.mubr.msk.f32.vlgmr.msra.gmra.mrb[4].mxu0 %vm98_vm0, %v764_v55  ;;  %206 = vperm.xlu0 %954, %v200_v59  }
  0x41   :  { %889 = vmatmul.mubr.msk.f32.vlgmr.msra.gmra.mrb[4].mxu1 %vm98_vm0, %v766_v57  ;;  %211 = vperm.xlu1 %955, %v201_v60  }
  0x44   :  { %300 = vperm.xlu0 %954, %v752_v61  }
  0x45   :  { %411 = vperm.xlu1 %955, %v757_v62  }
  0x48   :  { %416 = vperm.xlu0 %954, %v758_v63  }
  0x49   :  { %504 = vperm.xlu1 %955, %v778_v0  }
  0x4c   :  { %615 = vperm.xlu0 %954, %v783_v1  }
  0x4d   :  { %620 = vperm.xlu1 %955, %v784_v2  }
  0x50   :  { %216 = vperm.xlu0 %954, %v202_v3  }
  0x51   :  { %421 = vperm.xlu1 %955, %v759_v4  }
  0x54   :  { %625 = vperm.xlu0 %954, %v785_v5  }
  0x55   :  { %221 = vperm.xlu1 %955, %v203_v6  }
  0x58   :  { %426 = vperm.xlu0 %954, %v760_v7  }
  0x59   :  { %630 = vperm.xlu1 %955, %v786_v8  }
  0xa4   :  { %v81_v9 = vpop.permute.xlu0 %80 }
  0xa6   :  { %v286_v10 = vpop.permute.xlu1 %285 }
  0xa8   :  { %v86_v11 = vpop.permute.xlu0 %85 }
  0xaa   :  { %v291_v12 = vpop.permute.xlu1 %290 }
  0xac   :  { %v1321_v13 = vpop.permute.xlu0 %489 }
  0xae   :  { %v1323_v14 = vpop.permute.xlu1 %494 }
  0xb7   :  { %v91_v15 = vpop.permute.xlu0 %90 }
  0xb8   :  { %v296_v16 = vpop.permute.xlu1 %295 }
  0xbb   :  { %v1325_v17 = vpop.permute.xlu0 %499 }
  0xbc   :  { %v96_v18 = vpop.permute.xlu1 %95 }
  0xbf   :  { %v207_v19 = vpop.permute.xlu0 %206 }
  0xc0   :  { %v212_v20 = vpop.permute.xlu1 %211 }
  0xc3   :  { %v301_v21 = vpop.permute.xlu0 %300 }
  0xc4   :  { %v412_v22 = vpop.permute.xlu1 %411 }
  0xc7   :  { %v417_v23 = vpop.permute.xlu0 %416 }
  0xc8   :  { %v505_v24 = vpop.permute.xlu1 %504 }
  0xcb   :  { %v1327_v25 = vpop.permute.xlu0 %615 }
  0xcc   :  { %v1329_v26 = vpop.permute.xlu1 %620 }
  0xcf   :  { %v217_v27 = vpop.permute.xlu0 %216 }
  0xd0   :  { %v422_v35 = vpop.permute.xlu1 %421 }
  0xd3   :  { %v1331_v38 = vpop.permute.xlu0 %625 }
  0xd4   :  { %v222_v60 = vpop.permute.xlu1 %221 }
  0xd7   :  { %v427_v0 = vpop.permute.xlu0 %426 }
 0x103   :  { %v843_v28 = vpop.f32.mrb[0].mxu0 }
 0x104   :  { %v183_v29 = vadd.f32 %v843_v28, %v86_v11  ;;  %v865_v30 = vpop.f32.mrb[0].mxu1  ;;  %v177_v31 = vpop.f32.mrb[1].mxu0 }
 0x105   :  { %v387_v32 = vadd.f32 %v865_v30, %v291_v12  ;;  %v178_v33 = vadd.f32 %v177_v31, %v81_v9  ;;  %v381_v34 = vpop.f32.mrb[1].mxu1 }
 0x106   :  { %v197_v36 = vmax.f32 %v183_v29, 0.0  ;;  %v382_v37 = vadd.f32 %v381_v34, %v286_v10 }
 0x107   :  { %v401_v39 = vmax.f32 %v387_v32, 0.0  ;;  %v196_v40 = vmax.f32 %v178_v33, 0.0  ;;  %v846_v41 = vpop.f32.mrb[2].mxu0 }
 0x108   :  { %v225_v42 = vmul.f32 %v212_v20, %v197_v36  ;;  %v400_v43 = vmax.f32 %v382_v37, 0.0  ;;  %v193_v44 = vadd.f32 %v846_v41, %v96_v18  ;;  %v868_v45 = vpop.f32.mrb[2].mxu1  ;;  %v187_v46 = vpop.f32.mrb[3].mxu0 }
 0x109   :  { %v430_v47 = vmul.f32 %v417_v23, %v401_v39  ;;  %v224_v48 = vmul.f32 %v207_v19, %v196_v40  ;;  %v397_v49 = vadd.f32 %v868_v45, %v301_v21  ;;  %v188_v50 = vadd.f32 %v187_v46, %v91_v15  ;;  %v391_v51 = vpop.f32.mrb[3].mxu1 }
 0x10a   :  { %v230_v52 = vsel %vm228_vm1, %v225_v42, 0.0  ;;  %v429_v53 = vmul.f32 %v412_v22, %v400_v43  ;;  %v199_v54 = vmax.f32 %v193_v44, 0.0  ;;  %v392_v55 = vadd.f32 %v391_v51, %v296_v16 }
 0x10b   :  { %v434_v56 = vsel %vm228_vm1, %v430_v47, 0.0  ;;  %v229_v57 = vsel %vm228_vm1, %v224_v48, 0.0  ;;  %v403_v58 = vmax.f32 %v397_v49, 0.0  ;;  %v198_v59 = vmax.f32 %v188_v50, 0.0 }
 0x10c   :  { %v231_v61 = vadd.f32 %v230_v52, %v229_v57  ;;  %v433_v62 = vsel %vm228_vm1, %v429_v53, 0.0  ;;  %v402_v63 = vmax.f32 %v392_v55, 0.0  ;;  %v227_v2 = vmul.f32 %v222_v60, %v199_v54 }
 0x10d   :  { %v435_v1 = vadd.f32 %v434_v56, %v433_v62  ;;  %v226_v3 = vmul.f32 %v217_v27, %v198_v59  ;;  %v432_v4 = vmul.f32 %v427_v0, %v403_v58  ;;  %v243_v45 = vstv %s1342_s3 }
 0x10e   :  { %v431_v5 = vmul.f32 %v422_v35, %v402_v63  ;;  %v234_v9 = vsel %vm228_vm1, %v227_v2, 0.0  ;;  %v447_v48 = vstv %s1345_s18  ;;  %v261_v54 = vstv %s1350_s19 }
 0x10f   :  { %v232_v6 = vsel %vm228_vm1, %v226_v3, 0.0  ;;  %v438_v11 = vsel %vm228_vm1, %v432_v4, 0.0  ;;  %v465_v57 = vstv %s762_s1 }
 0x110   :  { %v233_v7 = vadd.f32 %v232_v6, %v231_v61  ;;  %v436_v8 = vsel %vm228_vm1, %v431_v5, 0.0 }
 0x111   :  { %v437_v10 = vadd.f32 %v436_v8, %v435_v1 }
 0x112   :  { %v235_v12 = vadd.f32 %v234_v9, %v233_v7  ;;  %v651_v7 = vstv %s787_s20 }
 0x113   :  { %v439_v15 = vadd.f32 %v438_v11, %v437_v10  ;;  %v887_v16 = vpop.f32.mrb[4].mxu0  ;;  %v57_v10 = vlaneseq  ;;  %v669_v11 = vstv %s788_s21 }
 0x114   :  { %v236_v18 = vrot.slane %v235_v12, 4  ;;  %v591_v19 = vadd.f32 %v887_v16, %v1323_v14  ;;  %v890_v20 = vpop.f32.mrb[4].mxu1  ;;  %v585_v21 = vpop.f32.mrb[5].mxu0 }
 0x115   :  { %v440_v22 = vrot.slane %v439_v15, 4  ;;  %v601_v23 = vadd.f32 %v890_v20, %v505_v24  ;;  %v586_v27 = vadd.f32 %v585_v21, %v1321_v13  ;;  %v595_v28 = vpop.f32.mrb[5].mxu1  ;;  %v631_v13 = vpop.permute.xlu1 %630  ;;  %v685_v21 = vstv %s1416_s6  ;;  %s1070_s6 = smov [#allocation8]  }
 0x116   :  { %v237_v29 = vadd.f32 %v236_v18, %v235_v12  ;;  %v605_v30 = vmax.f32 %v591_v19, 0.0  ;;  %v596_v31 = vadd.f32 %v595_v28, %v1325_v17  ;;  %v58_v19 = vand.u32 127, %v57_v10  ;;  %s695_s24 = sshll.u32 %s1070_s6, 4  ;;  %s696_s24 = int_to_ptr.vmem [resolvable:$true] %s695_s24 }
 0x117   :  { %v441_v32 = vadd.f32 %v440_v22, %v439_v15  ;;  %v607_v33 = vmax.f32 %v601_v23, 0.0  ;;  %v604_v34 = vmax.f32 %v586_v27, 0.0  ;;  %s992_s25 = scalar_lea.vmem %s696_s24, 64  ;;  %p997_p11 = scmp.lt.s32.totalorder %s696_s24, %s696_s24 }
 0x118   :  { %v238_v35 = vrot.slane %v237_v29, 2  ;;  %v634_v14 = vmul.f32 %v1329_v26, %v605_v30  ;;  %v606_v36 = vmax.f32 %v596_v31, 0.0  ;;  %vm59_vm6 = vcmp.lt.s32.totalorder %v58_v19, 8  ;;  %p993_p10 = scmp.ne.s32.totalorder %s696_s24, %s992_s25  ;;  %p998_p12 = scmp.lt.s32.totalorder %s992_s25, %s992_s25 }
 0x119   :  { %v442_v37 = vrot.slane %v441_v32, 2  ;;  %v633_v24 = vmul.f32 %v1327_v25, %v604_v34  ;;  %v636_v42 = vmul.f32 %v631_v13, %v607_v33  ;;  %v1069_v31 = vmov 0.0  }
 0x11a   :  { %v239_v39 = vadd.f32 %v238_v35, %v237_v29  ;;  %v638_v40 = vsel %vm228_vm1, %v634_v14, 0.0  ;;  %v635_v17 = vmul.f32 %v1331_v38, %v606_v36  ;;  %p999_p13 = por %p998_p12, %p997_p11 }
 0x11b   :  { %v443_v41 = vadd.f32 %v442_v37, %v441_v32  ;;  %v637_v43 = vsel %vm228_vm1, %v633_v24, 0.0  ;;  %v642_v51 = vsel %vm228_vm1, %v636_v42, 0.0  ;;  %v732_v32 = vsel %vm59_vm6, 1.0, %v1069_v31 }
 0x11c   :  { %v240_v26 = vrot.slane %v239_v39, 1  ;;  %v639_v44 = vadd.f32 %v638_v40, %v637_v43  ;;  %v640_v25 = vsel %vm228_vm1, %v635_v17, 0.0  ;;  %p1000_p0 = pnand %p999_p13, %p993_p10 }
 0x11d   :  { %v444_v46 = vrot.slane %v443_v41, 1 }
 0x11e   :  { %v241_v47 = vadd.f32 %v240_v26, %v239_v39  ;;  %v641_v49 = vadd.f32 %v640_v25, %v639_v44 }
 0x11f   :  { %v445_v50 = vadd.f32 %v444_v46, %v443_v41 }
 0x120   :  { %v244_v52 = vadd.f32 %v243_v45, %v241_v47  ;;  %v643_v38 = vadd.f32 %v642_v51, %v641_v49 }
 0x121   :  { %v448_v53 = vadd.f32 %v447_v48, %v445_v50 }
 0x122   :  { %v644_v55 = vrot.slane %v643_v38, 4  ;;  %v248_v56 = vand.u32 2147483647, %v244_v52  ;;  %v262_v62 = vmul.f32 %v261_v54, %v244_v52  ;;  %v245_v33 = vmax.f32 %v244_v52, 0.0 }
 0x123   :  { %v452_v58 = vand.u32 2147483647, %v448_v53  ;;  %v673_v59 = vsel %vm672_vm2, %v244_v52, %v448_v53  ;;  %v466_v0 = vmul.f32 %v465_v57, %v448_v53  ;;  %v246_v34 = vmul.f32 %v732_v32, %v244_v52 }
 0x124   :  { %v645_v60 = vadd.f32 %v644_v55, %v643_v38  ;;  %v249_v61 = vsub.f32 0.0, %v248_v56  ;;  %v449_v35 = vmax.f32 %v448_v53, 0.0  ;;  %v450_v14 = vmul.f32 %v732_v32, %v448_v53 }
 0x125   :  { %v453_v63 = vsub.f32 0.0, %v452_v58  ;;  %v467_v4 = vadd.f32 %v466_v0, %v262_v62  ;;  %v247_v24 = vsub.f32 %v245_v33, %v246_v34 }
 0x126   :  { %v646_v1 = vrot.slane %v645_v60, 2  ;;  %v250_v2 = vmul.f32 1.442695, %v249_v61  ;;  %v451_v40 = vsub.f32 %v449_v35, %v450_v14 }
 0x127   :  { %v454_v3 = vmul.f32 1.442695, %v453_v63 }
 0x128   :  { %v647_v5 = vadd.f32 %v646_v1, %v645_v60  ;;  %956 = vpow2.f32 %v250_v2 }
 0x129   :  { %958 = vpow2.f32 %v454_v3 }
 0x12a   :  { %v648_v6 = vrot.slane %v647_v5, 1 }
 0x12c   :  { %v649_v8 = vadd.f32 %v648_v6, %v647_v5 }
 0x12e   :  { %v652_v9 = vadd.f32 %v651_v7, %v649_v8 }
 0x130   :  { %v656_v12 = vand.u32 2147483647, %v652_v9  ;;  %v675_v15 = vsel %vm674_vm3, %v673_v59, %v652_v9  ;;  %v670_v16 = vmul.f32 %v669_v11, %v652_v9  ;;  %v653_v45 = vmax.f32 %v652_v9, 0.0 }
 0x131   :  { %677 = vst.msk [vmem:[#allocation8] sm:$0x7] %vm676_vm4, %v675_v15  ;;  %v654_v46 = vmul.f32 %v732_v32, %v652_v9 }
 0x132   :  { %v957_v18 = vpop.eup %956  ;;  %v657_v20 = vsub.f32 0.0, %v656_v12  ;;  %v671_v27 = vadd.f32 %v670_v16, %v467_v4 }
 0x133   :  { %v959_v22 = vpop.eup %958  ;;  %v252_v23 = vadd.f32 1.0, %v957_v18  ;;  %v655_v47 = vsub.f32 %v653_v45, %v654_v46 }
 0x134   :  { %v456_v28 = vadd.f32 1.0, %v959_v22  ;;  %v658_v29 = vmul.f32 1.442695, %v657_v20  ;;  %v686_v30 = vadd.f32 %v685_v21, %v671_v27 }
 0x135   :  { %960 = vlog2.f32 %v252_v23 }
 0x136   :  { %962 = vlog2.f32 %v456_v28  ;;  %688 = vst.msk [vmem:[#allocation11] sm:$0x1] %vm687_vm5, %v686_v30 }
 0x137   :  { %964 = vpow2.f32 %v658_v29 }
 0x13f   :  { %v961_v36 = vpop.eup %960 }
 0x140   :  { %v963_v37 = vpop.eup %962  ;;  %v254_v13 = vmul.f32 0.6931472, %v961_v36 }
 0x141   :  { %v965_v39 = vpop.eup %964  ;;  %v458_v17 = vmul.f32 0.6931472, %v963_v37 }
 0x142   :  { %v255_v41 = vadd.f32 %v254_v13, %v247_v24  ;;  %v660_v42 = vadd.f32 1.0, %v965_v39 }
 0x143   :  { %v459_v43 = vadd.f32 %v458_v17, %v451_v40 }
 0x144   :  { %v256_v26 = vsel %vm228_vm1, %v255_v41, 0.0  ;;  %966 = vlog2.f32 %v660_v42 }
 0x145   :  { %v460_v44 = vsel %vm228_vm1, %v459_v43, 0.0  ;;  %257 = vadd.xlane.f32.xlu0 %v256_v26 }
 0x146   :  { %461 = vadd.xlane.f32.xlu1 %v460_v44 }
 0x14e   :  { %v967_v25 = vpop.eup %966 }
 0x14f   :  { %v662_v48 = vmul.f32 0.6931472, %v967_v25 }
 0x151   :  { %v663_v49 = vadd.f32 %v662_v48, %v655_v47 }
 0x153   :  { %v664_v50 = vsel %vm228_vm1, %v663_v49, 0.0 }
 0x154   :  { %665 = vadd.xlane.f32.xlu0 %v664_v50 }
 0x155   :  { %1003 = shalt.err (!%p1000_p0)
}
 0x156   :  { %s1004_s27 = scalar_lea.hbm %s1417_s7, 64 }
 0x157   :  { %p1005_p1 = scmp.ne.s32.totalorder %s1417_s7, %s1004_s27  ;;  %p1008_p2 = scmp.lt.u32.totalorder %s1004_s27, %s1417_s7 }
 0x159   :  { %p1010_p3 = pnand %p1008_p2, %p1005_p1 }
 0x15b   :  { %1013 = shalt.err (!%p1010_p3)
}
 0x15c   :  { %698 = dma.vmem_to_hbm [thread:$0]  %s696_s24, 64, %s1417_s7, [#allocation4]   ;;  %vm678_vm7 = vcmask 7168   ;;  %vm680_vm8 = vcmask 15360   ;;  %vm682_vm9 = vcmask 16384  }
 0x15d   :  { %s1071_s2 = smov [#allocation9]   ;;  %s1072_s14 = smov [#allocation11]  }
 0x15e   :  { %s705_s13 = sshll.u32 %s1071_s2, 4  ;;  %s715_s15 = sshll.u32 %s1072_s14, 4  ;;  %s706_s13 = int_to_ptr.vmem [resolvable:$true] %s705_s13  ;;  %s1378_s15 = int_to_ptr.vmem [resolvable:$true] %s715_s15 }
 0x15f   :  { %s1014_s7 = scalar_lea.vmem %s706_s13, 16  ;;  %s1018_s16 = scalar_lea.vmem %s706_s13, 32 }
 0x160   :  { %p1015_p4 = scmp.ne.s32.totalorder %s706_s13, %s1014_s7  ;;  %p1019_p5 = scmp.lt.s32.totalorder %s706_s13, %s706_s13 }
 0x161   :  { %p1020_p6 = scmp.lt.s32.totalorder %s1018_s16, %s1014_s7 }
 0x163   :  { %p1021_p7 = por %p1020_p6, %p1019_p5 }
 0x165   :  { %p1022_p8 = pnand %p1021_p7, %p1015_p4 }
 0x1d2   :  { %v258_v52 = vpop.xlane.xlu0 %257 }
 0x1d3   :  { %v462_v51 = vpop.xlane.xlu1 %461  ;;  %v259_v53 = vmul.f32 0.0625, %v258_v52 }
 0x1d4   :  { %v463_v38 = vmul.f32 0.0625, %v462_v51 }
 0x1d6   :  { %v679_v56 = vsel %vm678_vm7, %v259_v53, %v463_v38 }
 0x1e1   :  { %v666_v54 = vpop.xlane.xlu0 %665 }
 0x1e2   :  { %v667_v55 = vmul.f32 0.0625, %v666_v54 }
 0x1e4   :  { %v681_v57 = vsel %vm680_vm8, %v679_v56, %v667_v55 }
 0x1e5   :  { %683 = vst.msk [vmem:[#allocation9] sm:$0x1] %vm682_vm9, %v681_v57 }
 0x1e6   :  { %1025 = shalt.err (!%p1022_p8)
}
 0x1e7   :  { %s1026_s5 = scalar_lea.hbm %s1418_s8, 16 }
 0x1e8   :  { %p1027_p9 = scmp.ne.s32.totalorder %s1418_s8, %s1026_s5  ;;  %p1030_p10 = scmp.lt.u32.totalorder %s1026_s5, %s1418_s8 }
 0x1ea   :  { %p1032_p11 = pnand %p1030_p10, %p1027_p9 }
 0x1ec   :  { %1035 = shalt.err (!%p1032_p11)
}
 0x1ed   :  { %708 = dma.vmem_to_hbm [thread:$0]  %s706_s13, 16, %s1418_s8, [#allocation10]  }
 0x1ee   :  { %s1036_s22 = scalar_lea.vmem %s1378_s15, 16  ;;  %s1040_s23 = scalar_lea.vmem %s1378_s15, 32 }
 0x1ef   :  { %p1037_p12 = scmp.ne.s32.totalorder %s1378_s15, %s1036_s22  ;;  %p1041_p13 = scmp.lt.s32.totalorder %s1378_s15, %s1378_s15 }
 0x1f0   :  { %p1042_p0 = scmp.lt.s32.totalorder %s1040_s23, %s1036_s22 }
 0x1f2   :  { %p1043_p1 = por %p1042_p0, %p1041_p13 }
 0x1f4   :  { %p1044_p2 = pnand %p1043_p1, %p1037_p12 }
 0x1f6   :  { %1047 = shalt.err (!%p1044_p2)
}
 0x1f7   :  { %s1048_s25 = scalar_lea.hbm %s1419_s9, 16 }
 0x1f8   :  { %p1049_p3 = scmp.ne.s32.totalorder %s1419_s9, %s1048_s25  ;;  %p1052_p4 = scmp.lt.u32.totalorder %s1048_s25, %s1419_s9 }
 0x1fa   :  { %p1054_p5 = pnand %p1052_p4, %p1049_p3 }
 0x1fc   :  { %1057 = shalt.err (!%p1054_p5)
}
 0x1fd   :  { %718 = dma.vmem_to_hbm [thread:$0]  %s1378_s15, 16, %s1419_s9, [#allocation10]  }
 0x1fe   :  { %1062 = dma.done.wait [#allocation4], 64  }
 0x1ff   :  { %1063 = vsyncadd [#allocation4], 4294967232 }
 0x200   :  { %1064 = dma.done.wait [#allocation10], 32  }
 0x201   :  { %1065 = vsyncadd [#allocation10], 4294967264 }
 0x202   :  { %728 = vsyncpa [#allocation4], 1 }
 0x203   :  { %729 = vsyncpa [#allocation10], 1 }
 0x204   :  { %730 = vsyncpa [#allocation5], 1 }
 0x205   :  { %731 = vsyncpa [#allocation7], 1 }

</bundles_post_ra>
